<compile_context>
chip_gen: v7x
topology: tpu7x:2x2x1
jax: 0.10.0
libtpu: 0.0.40
codegen_flags: <defaults>
</compile_context>

<pallas_src>
import functools

import jax
import jax.numpy as jnp
from jax.experimental import pallas as pl
from jax.experimental.pallas import tpu as pltpu

EPS = 1e-5
MOMENTUM = 0.1  # module's self.momentum (overrides batch_norm's default of 0.9)


def _bn_kernel(x_ref, beta_ref, mm_ref, mv_ref,
               y_ref, new_mm_ref, new_mv_ref,
               *, inv_m, eps, momentum):
    # x_ref: (N, c_blk, H, W) f32 ; beta/mm/mv refs: (1, c_blk, 1, 1) f32
    x = x_ref[...]

    # Per-channel sum over (N, H, W). Reduce the batch axis first (cheap VPU adds
    # across vregs), then lane (W) / sublane (H) reductions on the small remainder.
    s = jnp.sum(x, axis=0, keepdims=True)            # (1, cb, H, W)
    s = jnp.sum(s, axis=3, keepdims=True)            # (1, cb, H, 1)
    s = jnp.sum(s, axis=2, keepdims=True)            # (1, cb, 1, 1)
    mu = s * inv_m                                   # per-channel mean

    diff = x - mu
    v = jnp.sum(diff * diff, axis=0, keepdims=True)  # centered (matches reference)
    v = jnp.sum(v, axis=3, keepdims=True)
    v = jnp.sum(v, axis=2, keepdims=True)
    var = v * inv_m                                  # biased variance

    inv_std = jax.lax.rsqrt(var + eps)               # EUP rsqrt (free VLIW slot)
    x_hat = diff * inv_std

    # 4-D training branch: sigmoid(X_hat) * X_hat + beta   (gamma unused)
    y_ref[...] = jax.nn.sigmoid(x_hat) * x_hat + beta_ref[...]

    # Moving statistics, reference convention: new = momentum*old + (1-momentum)*batch
    new_mm_ref[...] = momentum * mm_ref[...] + (1.0 - momentum) * mu
    new_mv_ref[...] = momentum * mv_ref[...] + (1.0 - momentum) * var


def _pick_c_blk(n, c, h, w, budget_bytes=2 * 1024 * 1024):
    """Largest channel-block size that (a) divides C, (b) keeps one (N,cb,H,W) f32
    block under the VMEM budget, and (c) leaves >= 2 grid steps (pipelining +
    v7x megacore) whenever C >= 2."""
    per_channel_bytes = n * h * w * 4
    best = 1
    for cb in range(1, c + 1):
        if c % cb != 0:
            continue
        if cb * per_channel_bytes > budget_bytes:
            continue
        if c >= 2 and c // cb < 2:
            continue
        best = cb
    return best


def batch_norm_forward(x_nchw, gamma, beta, moving_mean, moving_var,
                       *, eps=EPS, momentum=MOMENTUM):
    """Training-mode forward of the 4-D branch.

    x_nchw: (N, C, H, W). Returns (Y, new_moving_mean, new_moving_var) with the
    moving stats shaped (1, C, 1, 1) exactly as the PyTorch module produces them.
    gamma is accepted but unused (matches the reference 4-D branch).
    """
    del gamma  # unused in the 4-D branch of the reference
    n, c, h, w = x_nchw.shape

    x = x_nchw.astype(jnp.float32)
    beta4 = beta.reshape(1, c, 1, 1).astype(jnp.float32)
    mm4 = moving_mean.reshape(1, c, 1, 1).astype(jnp.float32)
    mv4 = moving_var.reshape(1, c, 1, 1).astype(jnp.float32)

    c_blk = _pick_c_blk(n, c, h, w)
    grid = (c // c_blk,)

    kernel = functools.partial(
        _bn_kernel, inv_m=1.0 / float(n * h * w), eps=float(eps),
        momentum=float(momentum))

    big_spec = pl.BlockSpec((n, c_blk, h, w), lambda ci: (0, ci, 0, 0))
    small_spec = pl.BlockSpec((1, c_blk, 1, 1), lambda ci: (0, ci, 0, 0))

    y, new_mm, new_mv = pl.pallas_call(
        kernel,
        out_shape=(
            jax.ShapeDtypeStruct((n, c, h, w), jnp.float32),
            jax.ShapeDtypeStruct((1, c, 1, 1), jnp.float32),
            jax.ShapeDtypeStruct((1, c, 1, 1), jnp.float32),
        ),
        grid=grid,
        in_specs=[big_spec, small_spec, small_spec, small_spec],
        out_specs=(big_spec, small_spec, small_spec),
        compiler_params=pltpu.CompilerParams(
            dimension_semantics=("parallel",),      # every block written once -> safe
            vmem_limit_bytes=32 * 1024 * 1024,      # headroom on all generations
        ),
    )(x, beta4, mm4, mv4)

    return y, new_mm, new_mv


if __name__ == "__main__":
    key = jax.random.PRNGKey(0)
    k_x, k_gamma = jax.random.split(key)

    N, C, H, W = 2, 4, 16, 16
    x = jax.random.normal(k_x, (N, C, H, W), dtype=jnp.float32)

    # Parameters exactly as in BatchNorm.__init__ / reset_parameters:
    gamma = jax.random.uniform(k_gamma, (C,), dtype=jnp.float32)  # uniform_ (unused in 4D branch)
    beta = jnp.zeros((C,), dtype=jnp.float32)                     # zeros_
    moving_mean = jnp.zeros((C,), dtype=jnp.float32)              # zeros_
    moving_var = jnp.ones((C,), dtype=jnp.float32)                # ones_

    y, new_mm, new_mv = batch_norm_forward(x, gamma, beta, moving_mean, moving_var)
    jax.block_until_ready((y, new_mm, new_mv))

    # Pure-JAX reference of the same math (4-D training branch).
    mu_ref = jnp.mean(x, axis=(0, 2, 3), keepdims=True)
    var_ref = jnp.mean((x - mu_ref) ** 2, axis=(0, 2, 3), keepdims=True)
    xhat_ref = (x - mu_ref) / jnp.sqrt(var_ref + EPS)
    y_ref = jax.nn.sigmoid(xhat_ref) * xhat_ref + beta.reshape(1, C, 1, 1)
    mm_ref = MOMENTUM * moving_mean.reshape(1, C, 1, 1) + (1.0 - MOMENTUM) * mu_ref
    mv_ref = MOMENTUM * moving_var.reshape(1, C, 1, 1) + (1.0 - MOMENTUM) * var_ref

    assert jnp.allclose(y, y_ref, atol=1e-5, rtol=1e-5)
    assert jnp.allclose(new_mm, mm_ref, atol=1e-5, rtol=1e-5)
    assert jnp.allclose(new_mv, mv_ref, atol=1e-5, rtol=1e-5)

    print("KERNEL_OK")
</pallas_src>

<mosaic_0001>
module attributes {stable_mosaic.version = 11 : i64} {
  func.func @_bn_kernel(%arg0: i32, %arg1: memref<2x2x16x16xf32, #tpu.memory_space<vmem>>, %arg2: memref<1x2x1x1xf32, #tpu.memory_space<vmem>>, %arg3: memref<1x2x1x1xf32, #tpu.memory_space<vmem>>, %arg4: memref<1x2x1x1xf32, #tpu.memory_space<vmem>>, %arg5: memref<2x2x16x16xf32, #tpu.memory_space<vmem>>, %arg6: memref<1x2x1x1xf32, #tpu.memory_space<vmem>>, %arg7: memref<1x2x1x1xf32, #tpu.memory_space<vmem>>) attributes {dimension_semantics = [#tpu.dimension_semantics<parallel>], iteration_bounds = array<i64: 2>, scalar_prefetch = 0 : i64, scratch_operands = 0 : i64, tpu.core_type = #tpu.core_type<tc>, window_params = [{transform_indices = @transform_0, window_bounds = array<i64: 2, 2, 16, 16>}, {transform_indices = @transform_1, window_bounds = array<i64: 1, 2, 1, 1>}, {transform_indices = @transform_2, window_bounds = array<i64: 1, 2, 1, 1>}, {transform_indices = @transform_3, window_bounds = array<i64: 1, 2, 1, 1>}, {transform_indices = @transform_4, window_bounds = array<i64: 2, 2, 16, 16>}, {transform_indices = @transform_5, window_bounds = array<i64: 1, 2, 1, 1>}, {transform_indices = @transform_6, window_bounds = array<i64: 1, 2, 1, 1>}]} {
    %c0 = arith.constant 0 : index
    %c0_0 = arith.constant 0 : index
    %c0_1 = arith.constant 0 : index
    %c0_2 = arith.constant 0 : index
    %0 = vector.load %arg1[%c0, %c0_0, %c0_1, %c0_2] : memref<2x2x16x16xf32, #tpu.memory_space<vmem>>, vector<2x2x16x16xf32>
    %cst = arith.constant dense<0.000000e+00> : vector<2x16x16xf32>
    %1 = vector.multi_reduction <add>, %0, %cst [0] : vector<2x2x16x16xf32> to vector<2x16x16xf32>
    %2 = vector.shape_cast %1 : vector<2x16x16xf32> to vector<1x2x16x16xf32>
    %cst_3 = arith.constant dense<0.000000e+00> : vector<1x2x16xf32>
    %3 = vector.multi_reduction <add>, %2, %cst_3 [3] : vector<1x2x16x16xf32> to vector<1x2x16xf32>
    %4 = vector.shape_cast %3 : vector<1x2x16xf32> to vector<1x2x16x1xf32>
    %cst_4 = arith.constant dense<0.000000e+00> : vector<1x2x1xf32>
    %5 = vector.multi_reduction <add>, %4, %cst_4 [2] : vector<1x2x16x1xf32> to vector<1x2x1xf32>
    %6 = vector.shape_cast %5 : vector<1x2x1xf32> to vector<1x2x1x1xf32>
    %cst_5 = arith.constant 0.001953125 : f32
    %7 = vector.broadcast %cst_5 : f32 to vector<1x2x1x1xf32>
    %8 = arith.mulf %6, %7 : vector<1x2x1x1xf32>
    %9 = vector.broadcast %8 : vector<1x2x1x1xf32> to vector<2x2x16x16xf32>
    %10 = arith.subf %0, %9 : vector<2x2x16x16xf32>
    %11 = arith.mulf %10, %10 : vector<2x2x16x16xf32>
    %cst_6 = arith.constant dense<0.000000e+00> : vector<2x16x16xf32>
    %12 = vector.multi_reduction <add>, %11, %cst_6 [0] : vector<2x2x16x16xf32> to vector<2x16x16xf32>
    %13 = vector.shape_cast %12 : vector<2x16x16xf32> to vector<1x2x16x16xf32>
    %cst_7 = arith.constant dense<0.000000e+00> : vector<1x2x16xf32>
    %14 = vector.multi_reduction <add>, %13, %cst_7 [3] : vector<1x2x16x16xf32> to vector<1x2x16xf32>
    %15 = vector.shape_cast %14 : vector<1x2x16xf32> to vector<1x2x16x1xf32>
    %cst_8 = arith.constant dense<0.000000e+00> : vector<1x2x1xf32>
    %16 = vector.multi_reduction <add>, %15, %cst_8 [2] : vector<1x2x16x1xf32> to vector<1x2x1xf32>
    %17 = vector.shape_cast %16 : vector<1x2x1xf32> to vector<1x2x1x1xf32>
    %cst_9 = arith.constant 0.001953125 : f32
    %18 = vector.broadcast %cst_9 : f32 to vector<1x2x1x1xf32>
    %19 = arith.mulf %17, %18 : vector<1x2x1x1xf32>
    %cst_10 = arith.constant 9.99999974E-6 : f32
    %20 = vector.broadcast %cst_10 : f32 to vector<1x2x1x1xf32>
    %21 = arith.addf %19, %20 : vector<1x2x1x1xf32>
    %22 = math.rsqrt %21 : vector<1x2x1x1xf32>
    %23 = vector.broadcast %22 : vector<1x2x1x1xf32> to vector<2x2x16x16xf32>
    %24 = arith.mulf %10, %23 : vector<2x2x16x16xf32>
    %25 = arith.negf %24 : vector<2x2x16x16xf32>
    %26 = math.exp %25 : vector<2x2x16x16xf32>
    %cst_11 = arith.constant 1.000000e+00 : f32
    %27 = vector.broadcast %cst_11 : f32 to vector<2x2x16x16xf32>
    %28 = arith.addf %27, %26 : vector<2x2x16x16xf32>
    %29 = arith.divf %27, %28 : vector<2x2x16x16xf32>
    %30 = arith.mulf %29, %24 : vector<2x2x16x16xf32>
    %c0_12 = arith.constant 0 : index
    %c0_13 = arith.constant 0 : index
    %c0_14 = arith.constant 0 : index
    %c0_15 = arith.constant 0 : index
    %31 = vector.load %arg2[%c0_12, %c0_13, %c0_14, %c0_15] : memref<1x2x1x1xf32, #tpu.memory_space<vmem>>, vector<1x2x1x1xf32>
    %32 = vector.broadcast %31 : vector<1x2x1x1xf32> to vector<2x2x16x16xf32>
    %33 = arith.addf %30, %32 : vector<2x2x16x16xf32>
    %c0_16 = arith.constant 0 : index
    %c0_17 = arith.constant 0 : index
    %c0_18 = arith.constant 0 : index
    %c0_19 = arith.constant 0 : index
    %34 = vector.load %arg5[%c0_16, %c0_17, %c0_18, %c0_19] : memref<2x2x16x16xf32, #tpu.memory_space<vmem>>, vector<2x2x16x16xf32>
    tpu.vector_store %arg5[%c0_16, %c0_17, %c0_18, %c0_19], %33 {strides = array<i32>} : memref<2x2x16x16xf32, #tpu.memory_space<vmem>>, vector<2x2x16x16xf32>,
    %c0_20 = arith.constant 0 : index
    %c0_21 = arith.constant 0 : index
    %c0_22 = arith.constant 0 : index
    %c0_23 = arith.constant 0 : index
    %35 = vector.load %arg3[%c0_20, %c0_21, %c0_22, %c0_23] : memref<1x2x1x1xf32, #tpu.memory_space<vmem>>, vector<1x2x1x1xf32>
    %cst_24 = arith.constant 1.000000e-01 : f32
    %36 = vector.broadcast %cst_24 : f32 to vector<1x2x1x1xf32>
    %37 = arith.mulf %36, %35 : vector<1x2x1x1xf32>
    %cst_25 = arith.constant 0.899999976 : f32
    %38 = vector.broadcast %cst_25 : f32 to vector<1x2x1x1xf32>
    %39 = arith.mulf %38, %8 : vector<1x2x1x1xf32>
    %40 = arith.addf %37, %39 : vector<1x2x1x1xf32>
    %c0_26 = arith.constant 0 : index
    %c0_27 = arith.constant 0 : index
    %c0_28 = arith.constant 0 : index
    %c0_29 = arith.constant 0 : index
    %41 = vector.load %arg6[%c0_26, %c0_27, %c0_28, %c0_29] : memref<1x2x1x1xf32, #tpu.memory_space<vmem>>, vector<1x2x1x1xf32>
    tpu.vector_store %arg6[%c0_26, %c0_27, %c0_28, %c0_29], %40 {strides = array<i32>} : memref<1x2x1x1xf32, #tpu.memory_space<vmem>>, vector<1x2x1x1xf32>,
    %c0_30 = arith.constant 0 : index
    %c0_31 = arith.constant 0 : index
    %c0_32 = arith.constant 0 : index
    %c0_33 = arith.constant 0 : index
    %42 = vector.load %arg4[%c0_30, %c0_31, %c0_32, %c0_33] : memref<1x2x1x1xf32, #tpu.memory_space<vmem>>, vector<1x2x1x1xf32>
    %cst_34 = arith.constant 1.000000e-01 : f32
    %43 = vector.broadcast %cst_34 : f32 to vector<1x2x1x1xf32>
    %44 = arith.mulf %43, %42 : vector<1x2x1x1xf32>
    %cst_35 = arith.constant 0.899999976 : f32
    %45 = vector.broadcast %cst_35 : f32 to vector<1x2x1x1xf32>
    %46 = arith.mulf %45, %19 : vector<1x2x1x1xf32>
    %47 = arith.addf %44, %46 : vector<1x2x1x1xf32>
    %c0_36 = arith.constant 0 : index
    %c0_37 = arith.constant 0 : index
    %c0_38 = arith.constant 0 : index
    %c0_39 = arith.constant 0 : index
    %48 = vector.load %arg7[%c0_36, %c0_37, %c0_38, %c0_39] : memref<1x2x1x1xf32, #tpu.memory_space<vmem>>, vector<1x2x1x1xf32>
    tpu.vector_store %arg7[%c0_36, %c0_37, %c0_38, %c0_39], %47 {strides = array<i32>} : memref<1x2x1x1xf32, #tpu.memory_space<vmem>>, vector<1x2x1x1xf32>,
    return
  }
  func.func @transform_0(%arg0: i32) -> (i32, i32, i32, i32) {
    %c0_i32 = arith.constant 0 : i32
    %c0_i32_0 = arith.constant 0 : i32
    %c0_i32_1 = arith.constant 0 : i32
    %c0_i32_2 = arith.constant 0 : i32
    return %c0_i32, %arg0, %c0_i32_0, %c0_i32_1 : i32, i32, i32, i32
  }
  func.func @transform_1(%arg0: i32) -> (i32, i32, i32, i32) {
    %c0_i32 = arith.constant 0 : i32
    %c0_i32_0 = arith.constant 0 : i32
    %c0_i32_1 = arith.constant 0 : i32
    %c0_i32_2 = arith.constant 0 : i32
    return %c0_i32, %arg0, %c0_i32_0, %c0_i32_1 : i32, i32, i32, i32
  }
  func.func @transform_2(%arg0: i32) -> (i32, i32, i32, i32) {
    %c0_i32 = arith.constant 0 : i32
    %c0_i32_0 = arith.constant 0 : i32
    %c0_i32_1 = arith.constant 0 : i32
    %c0_i32_2 = arith.constant 0 : i32
    return %c0_i32, %arg0, %c0_i32_0, %c0_i32_1 : i32, i32, i32, i32
  }
  func.func @transform_3(%arg0: i32) -> (i32, i32, i32, i32) {
    %c0_i32 = arith.constant 0 : i32
    %c0_i32_0 = arith.constant 0 : i32
    %c0_i32_1 = arith.constant 0 : i32
    %c0_i32_2 = arith.constant 0 : i32
    return %c0_i32, %arg0, %c0_i32_0, %c0_i32_1 : i32, i32, i32, i32
  }
  func.func @transform_4(%arg0: i32) -> (i32, i32, i32, i32) {
    %c0_i32 = arith.constant 0 : i32
    %c0_i32_0 = arith.constant 0 : i32
    %c0_i32_1 = arith.constant 0 : i32
    %c0_i32_2 = arith.constant 0 : i32
    return %c0_i32, %arg0, %c0_i32_0, %c0_i32_1 : i32, i32, i32, i32
  }
  func.func @transform_5(%arg0: i32) -> (i32, i32, i32, i32) {
    %c0_i32 = arith.constant 0 : i32
    %c0_i32_0 = arith.constant 0 : i32
    %c0_i32_1 = arith.constant 0 : i32
    %c0_i32_2 = arith.constant 0 : i32
    return %c0_i32, %arg0, %c0_i32_0, %c0_i32_1 : i32, i32, i32, i32
  }
  func.func @transform_6(%arg0: i32) -> (i32, i32, i32, i32) {
    %c0_i32 = arith.constant 0 : i32
    %c0_i32_0 = arith.constant 0 : i32
    %c0_i32_1 = arith.constant 0 : i32
    %c0_i32_2 = arith.constant 0 : i32
    return %c0_i32, %arg0, %c0_i32_0, %c0_i32_1 : i32, i32, i32, i32
  }
}

</mosaic_0001>

<bundles_post_ra>
// kernel: tpu_custom_call.1
= control target key start
LH: loop header
LB: loop body
LE: loop exit
PB: predicated region body
PF: predicated region fallthrough
CT: control target
= control target key end

     0   :  { %12 = vsyncpa [#allocation3], 0  ;;  %s1279_s0 = inlined_call_operand.hbm [shape: f32[2,4,16,16], index: 0, kind: input, shape index: {}]   ;;  %s1280_s1 = inlined_call_operand.vmem [shape: f32[1,4,1,1], index: 1, kind: input, shape index: {}]   ;;  %s1281_s2 = inlined_call_operand.vmem [shape: f32[1,4,1,1], index: 2, kind: input, shape index: {}]   ;;  %s1282_s3 = inlined_call_operand.vmem [shape: f32[1,4,1,1], index: 3, kind: input, shape index: {}]   ;;  %s1283_s4 = inlined_call_operand.hbm [shape: f32[2,4,16,16], index: 4, kind: output, shape index: {0}]   ;;  %s1284_s5 = inlined_call_operand.vmem [shape: f32[1,4,1,1], index: 5, kind: output, shape index: {1}]   ;;  %s1285_s6 = inlined_call_operand.vmem [shape: f32[1,4,1,1], index: 6, kind: output, shape index: {2}]  }
   0x1   :  { %14 = vsyncpa [#allocation3 + $0x1], 0 }
   0x2   :  { %15 = vsyncpa [#allocation4], 0 }
   0x3   :  { %17 = vsyncpa [#allocation4 + $0x1], 0  ;;  %s1040_s21 = smov 0   ;;  %s1042_s22 = smov 0  }
   0x4   :  { %s1044_s23 = smov 0   ;;  %s1046_s24 = smov 0  }
   0x5 LB: > { %s1061_s25 = sadd.s32 4294967295, %s989_s24   ;;  %s808_s26 = sadd.s32 4294967294, %s989_s24   ;;  %s989_s24 = sphi %s1046_s24, %s1295_s24   ;;  %s985_s23 = sphi %s1044_s23, %s1294_s23   ;;  %s981_s22 = sphi %s1042_s22, %s1293_s22   ;;  %s977_s21 = sphi %s1040_s21, %s1292_s21  }
   0x6   : > { %s1065_s27 = sadd.s32 1, %s989_s24   ;;  %s30_s28 = sadd.s32 1, %s985_s23 }
   0x7   : > { %s27_s29 = ssub.s32 %s989_s24, %s1065_s27  ;;  %p37_p0 = scmp.ne.s32.totalorder %s985_s23, %s981_s22 }
   0x8   : > { %p28_p1 = scmp.eq.s32.totalorder %s27_s29, 0  ;;  %p38_p2 = scmp.eq.s32.totalorder %s989_s24, 0 }
   0x9   : > { %p43_p3 = scmp.ne.s32.totalorder %s981_s22, %s977_s21  ;;  %p44_p4 = scmp.eq.s32.totalorder %s1061_s25, 0 }
   0xa   : > { %s1077_s30 = scalar_select %p28_p1, %s985_s23, %s30_s28  }
   0xb   : > { %p1079_p5 = por %p38_p2, %p37_p0  ;;  %p1083_p6 = por %p44_p4, %p43_p3 }
   0xc   : > { %1286 = sst [smem:[#allocation13_spill]] %s1077_s30  ;;  %p145_p7 = scmp.eq.s32.totalorder %s1061_s25, 1 }
   0xd   : > { %p151_p8 = scmp.eq.s32.totalorder %s808_s26, 1  ;;  %p810_p11 = scmp.ge.s32.totalorder %s989_s24, 2 }
   0xe   : > { %p1088_p9 = por %p145_p7, %p37_p0 }
   0xf   : > { %p1092_p10 = por %p151_p8, %p43_p3  ;;  %219 = sbr.rel (%p810_p11) target bundleno = 35 (0x23), region = 16 }
  0x16   : > { %s223_s11 = sand.u32 1, %s985_s23   ;;  %s842_s12 = sshll.u32 %s989_s24, 9 }
  0x17   : > { %s811_s13 = sshll.u32 %s223_s11, 6  ;;  %s234_s16 = scalar_lea.hbm %s1279_s0, %s842_s12 }
  0x18   : > { %s845_s17 = scalar_select %p1079_p5, [#allocation0], [#allocation10] }
  0x19   : > { %s227_s18 = scalar_lea.vmem [#allocation2], %s811_s13  ;;  %s991_s26 = smov 1024  }
  0x1a   : > { %s247_s19 = sshll.u32 %s227_s18, 4  ;;  %s239_s20 = sld [smem:[%s845_s17]]   ;;  %s248_s19 = int_to_ptr.vmem [resolvable:$true] %s247_s19 }
  0x1b   : > { %846 = sst [smem:[#allocation7]] (%p1079_p5), %s991_s26  ;;  %s992_s28 = smov 512  }
  0x1c   : > { %847 = sst [smem:[#allocation7 + $0x1]] (%p1079_p5), %s992_s28  ;;  %s993_s29 = smov 4  }
  0x1d   : > { %848 = sst [smem:[#allocation7 + $0x2]] (%p1079_p5), %s993_s29  ;;  %s994_s30 = smov 128  }
  0x1e   : > { %849 = sst [smem:[#allocation7 + $0x3]] (%p1079_p5), %s994_s30  ;;  %s995_s13 = smov 8  }
  0x1f   : > { %850 = sst [smem:[#allocation7 + $0x4]] (%p1079_p5), %s994_s30  ;;  %s224_s15 = scalar_lea.sflag [#allocation3], %s223_s11 }
  0x20   : > { %s815_s12 = sshll.u32 %s239_s20, 26  ;;  %851 = sst [smem:[#allocation7 + $0x5]] (%p1079_p5), %s995_s13 }
  0x21   : > { %s816_s14 = sadd.s32 134217728, %s815_s12  ;;  %s996_s17 = smov [#allocation6]  }
  0x22   : > { %852 = dma.general (%p1079_p5), %s234_s16, 1024, %s248_s19, %s224_s15, %s996_s17, [#allocation7], %s816_s14, 0  }
  0x23 PF: > { %p817_p12 = scmp.ge.s32.totalorder %s989_s24, 1  ;;  %p292_p13 = scmp.lt.s32.totalorder %s989_s24, 3 }
  0x25   : > { %p293_p0 = pnand %p817_p12, %p292_p13 }
  0x26   : > { %s1123_s18 = sand.u32 (!%p293_p0), 1, %s981_s22  }
  0x27   : > { %296 = sbr.rel (%p293_p0) target bundleno = 445 (0x1bd), region = 36  ;;  %s818_s30 = sshll.u32 (!%p293_p0), %s1123_s18, 6 }
  0x28   : > { %s299_s20 = scalar_lea.sflag (!%p293_p0), [#allocation3], %s1123_s18  ;;  %s302_s11 = scalar_lea.vmem (!%p293_p0), [#allocation2], %s818_s30 }
  0x2e   : > { %968 = dma.done.wait (%p1083_p6), %s299_s20, 1024  }
  0x2f   : > { %970 = vsyncadd (%p1083_p6), %s299_s20, 4294966272  ;;  %vm386_vm0 = vcmask 130048   ;;  %v380_v0 = vld [vmem:[%s302_s11 + $0x10] sm:$0xff]  ;;  %v1135_v2 = vld [vmem:[%s302_s11] sm:$0xff]  ;;  %v997_v24 = vmov 0   ;;  %s820_s7 = sshll.u32 %s1061_s25, 1 }
  0x30   : > { %v1133_v1 = vld [vmem:[%s302_s11 + $0x30] sm:$0xff]  ;;  %v393_v3 = vsel %vm386_vm0, %v380_v0, 0.0  ;;  %v382_v5 = vld [vmem:[%s302_s11 + $0x20] sm:$0xff]  ;;  %v387_v6 = vsel %vm386_vm0, %v1135_v2, 0.0  ;;  %v381_v7 = vld [vmem:[%s302_s11 + $0x18] sm:$0xff]  ;;  %913 = vset.pattern.permute.xlu0 %v997_v24  ;;  %914 = vset.pattern.permute.xlu1 %v997_v24  ;;  %p353_p1 = scmp.lt.s32.totalorder %s820_s7, 3 }
  0x31   : > { %v394_v4 = vsel %vm386_vm0, %v1133_v1, 0.0  ;;  %v385_v8 = vld [vmem:[%s302_s11 + $0x38] sm:$0xff]  ;;  %v388_v10 = vsel %vm386_vm0, %v382_v5, 0.0  ;;  %v396_v11 = vsel %vm386_vm0, %v381_v7, 0.0  ;;  %v379_v13 = vld [vmem:[%s302_s11 + $0x8] sm:$0xff]  ;;  %vm595_vm1 = vcmask 0  }
  0x32   : > { %v395_v9 = vadd.f32 %v394_v4, %v393_v3  ;;  %v397_v12 = vsel %vm386_vm0, %v385_v8, 0.0  ;;  %v383_v14 = vld [vmem:[%s302_s11 + $0x28] sm:$0xff]  ;;  %v389_v15 = vadd.f32 %v388_v10, %v387_v6  ;;  %v390_v17 = vsel %vm386_vm0, %v379_v13, 0.0  ;;  %s1297_s7 = smov (!%p353_p1, %s820_s7), 3 }
  0x33   : > { %v398_v16 = vadd.f32 %v397_v12, %v396_v11  ;;  %v391_v18 = vsel %vm386_vm0, %v383_v14, 0.0  ;;  %s360_s19 = scalar_lea.vmem %s1281_s2, %s1297_s7  ;;  %s371_s29 = scalar_lea.vmem %s1284_s5, %s1297_s7 }
  0x34   : > { %v405_v19 = vsel %vm386_vm0, %v395_v9, 0.0  ;;  %v392_v20 = vadd.f32 %v391_v18, %v390_v17  ;;  %v399_v21 = vsel %vm386_vm0, %v389_v15, 0.0  ;;  %v587_v42 = vld [vmem:[%s360_s19] sm:$0x1]  ;;  %v588_v43 = vld [vmem:[%s360_s19 + $0x1] sm:$0x1]  ;;  %s355_s14 = scalar_lea.vmem %s1280_s1, %s1297_s7  ;;  %s365_s20 = scalar_lea.vmem %s1282_s3, %s1297_s7 }
  0x35   : > { %406 = vadd.xlane.f32.xlu1 %v405_v19  ;;  %400 = vadd.xlane.f32.xlu0 %v399_v21  ;;  %v408_v22 = vsel %vm386_vm0, %v398_v16, 0.0  ;;  %v589_v47 = vmul.f32 0.1, %v587_v42  ;;  %v590_v48 = vmul.f32 0.1, %v588_v43  ;;  %s376_s16 = scalar_lea.vmem %s1285_s6, %s1297_s7  ;;  %s338_s7 = scalar_lea.vmem [#allocation5], %s818_s30 }
  0x36   : > { %v402_v23 = vsel %vm386_vm0, %v392_v20, 0.0  ;;  %v834_v21 = vld [vmem:[%s355_s14 + $0x1] ss:$0 sm:$0xff]  ;;  %s609_s30 = scalar_lea.sflag [#allocation4], %s1123_s18 }
  0x37   : > { %v599_v43 = vld [vmem:[%s365_s20 + $0x1] sm:$0x1] }
  0x39   : > { %409 = vadd.xlane.f32.xlu1 %v408_v22  ;;  %403 = vadd.xlane.f32.xlu0 %v402_v23  ;;  %v833_v22 = vld [vmem:[%s355_s14] ss:$0 sm:$0xff] }
  0xc2   : > { %v407_v25 = vpop.xlane.xlu1 %406  ;;  %v401_v26 = vpop.xlane.xlu0 %400 }
  0xc6   : > { %v410_v27 = vpop.xlane.xlu1 %409  ;;  %v404_v29 = vpop.xlane.xlu0 %403 }
  0xc7   : > { %v418_v28 = vadd.f32 %v410_v27, %v407_v25  ;;  %v411_v30 = vadd.f32 %v404_v29, %v401_v26 }
  0xc9   : > { %v419_v31 = vrot.slane %v418_v28, 4  ;;  %v412_v32 = vrot.slane %v411_v30, 4 }
  0xcb   : > { %v420_v33 = vadd.f32 %v419_v31, %v418_v28  ;;  %v413_v34 = vadd.f32 %v412_v32, %v411_v30 }
  0xcd   : > { %v421_v35 = vrot.slane %v420_v33, 2  ;;  %v414_v36 = vrot.slane %v413_v34, 2 }
  0xcf   : > { %v422_v37 = vadd.f32 %v421_v35, %v420_v33  ;;  %v415_v38 = vadd.f32 %v414_v36, %v413_v34 }
  0xd1   : > { %v423_v39 = vrot.slane %v422_v37, 1  ;;  %v416_v40 = vrot.slane %v415_v38, 1 }
  0xd3   : > { %v424_v41 = vadd.f32 %v423_v39, %v422_v37  ;;  %v417_v44 = vadd.f32 %v416_v40, %v415_v38  ;;  %v598_v37 = vld [vmem:[%s365_s20] sm:$0x1] }
  0xd4   : > { %v600_v40 = vmul.f32 0.1, %v598_v37 }
  0xd5   : > { %v426_v45 = vmul.f32 0.001953125, %v424_v41  ;;  %v425_v46 = vmul.f32 0.001953125, %v417_v44 }
  0xd7   : > { %v1158_v49 = vsub.f32 %v381_v7, %v426_v45  ;;  %v1160_v50 = vsub.f32 %v385_v8, %v426_v45  ;;  %v1162_v51 = vsub.f32 %v380_v0, %v426_v45  ;;  %v591_v52 = vmul.f32 0.9, %v425_v46 }
  0xd8   : > { %v1164_v53 = vsub.f32 %v379_v13, %v425_v46  ;;  %v1166_v54 = vsub.f32 %v383_v14, %v425_v46  ;;  %v1169_v55 = vsub.f32 %v1135_v2, %v425_v46  ;;  %v1171_v56 = vsub.f32 %v382_v5, %v425_v46 }
  0xd9   : > { %v438_v57 = vmul.f32 %v1158_v49, %v1158_v49  ;;  %v442_v58 = vmul.f32 %v1160_v50, %v1160_v50  ;;  %v1178_v59 = vsub.f32 %v1133_v1, %v426_v45  ;;  %v437_v63 = vmul.f32 %v1162_v51, %v1162_v51 }
  0xda   : > { %v436_v60 = vmul.f32 %v1164_v53, %v1164_v53  ;;  %v440_v61 = vmul.f32 %v1166_v54, %v1166_v54  ;;  %v435_v62 = vmul.f32 %v1169_v55, %v1169_v55  ;;  %v592_v0 = vmul.f32 0.9, %v426_v45 }
  0xdb   : > { %v439_v2 = vmul.f32 %v1171_v56, %v1171_v56  ;;  %v452_v1 = vsel %vm386_vm0, %v438_v57, 0.0  ;;  %v441_v3 = vmul.f32 %v1178_v59, %v1178_v59  ;;  %v453_v7 = vsel %vm386_vm0, %v442_v58, 0.0 }
  0xdc   : > { %v446_v4 = vsel %vm386_vm0, %v436_v60, 0.0  ;;  %v447_v5 = vsel %vm386_vm0, %v440_v61, 0.0  ;;  %v443_v6 = vsel %vm386_vm0, %v435_v62, 0.0  ;;  %v449_v10 = vsel %vm386_vm0, %v437_v63, 0.0 }
  0xdd   : > { %v448_v8 = vadd.f32 %v447_v5, %v446_v4  ;;  %v444_v9 = vsel %vm386_vm0, %v439_v2, 0.0  ;;  %v450_v11 = vsel %vm386_vm0, %v441_v3, 0.0  ;;  %v593_v13 = vadd.f32 %v591_v52, %v589_v47 }
  0xde   : > { %v445_v12 = vadd.f32 %v444_v9, %v443_v6  ;;  %v454_v15 = vadd.f32 %v453_v7, %v452_v1  ;;  %v594_v16 = vadd.f32 %v592_v0, %v590_v48  ;;  %v451_v18 = vadd.f32 %v450_v11, %v449_v10 }
  0xdf   : > { %v458_v14 = vsel %vm386_vm0, %v448_v8, 0.0  ;;  %596 = vst.msk [vmem:[%s371_s29] sm:$0x1] %vm595_vm1, %v593_v13  ;;  %v601_v48 = vmul.f32 0.1, %v599_v43 }
  0xe0   : > { %459 = vadd.xlane.f32.xlu1 %v458_v14  ;;  %v455_v17 = vsel %vm386_vm0, %v445_v12, 0.0  ;;  %597 = vst.msk [vmem:[%s371_s29 + $0x1] sm:$0x1] %vm595_vm1, %v594_v16  ;;  %v464_v19 = vsel %vm386_vm0, %v454_v15, 0.0  ;;  %v461_v20 = vsel %vm386_vm0, %v451_v18, 0.0 }
  0xe1   : > { %456 = vadd.xlane.f32.xlu0 %v455_v17 }
  0xe4   : > { %465 = vadd.xlane.f32.xlu1 %v464_v19 }
  0xe5   : > { %462 = vadd.xlane.f32.xlu0 %v461_v20 }
  0xf5   : > { %568 = vperm.xlu1 %914, %v834_v21  }
  0xfb   : > { %564 = vperm.xlu0 %913, %v833_v22  }
 0x16d   : > { %v460_v23 = vpop.xlane.xlu1 %459 }
 0x16e   : > { %v457_v24 = vpop.xlane.xlu0 %456 }
 0x16f   : > { %v467_v25 = vadd.f32 %v460_v23, %v457_v24 }
 0x171   : > { %v468_v26 = vrot.slane %v467_v25, 4  ;;  %v466_v27 = vpop.xlane.xlu1 %465 }
 0x172   : > { %v463_v28 = vpop.xlane.xlu0 %462 }
 0x173   : > { %v469_v29 = vadd.f32 %v468_v26, %v467_v25  ;;  %v474_v30 = vadd.f32 %v466_v27, %v463_v28 }
 0x175   : > { %v470_v31 = vrot.slane %v469_v29, 2  ;;  %v475_v32 = vrot.slane %v474_v30, 4 }
 0x177   : > { %v471_v33 = vadd.f32 %v470_v31, %v469_v29  ;;  %v476_v34 = vadd.f32 %v475_v32, %v474_v30 }
 0x179   : > { %v472_v35 = vrot.slane %v471_v33, 1  ;;  %v477_v36 = vrot.slane %v476_v34, 2 }
 0x17a   : > { %v565_v24 = vpop.permute.xlu0 %564 }
 0x17b   : > { %v473_v38 = vadd.f32 %v472_v35, %v471_v33  ;;  %v478_v39 = vadd.f32 %v477_v36, %v476_v34  ;;  %v569_v35 = vpop.permute.xlu1 %568 }
 0x17d   : > { %v481_v41 = vmul.f32 0.001953125, %v473_v38  ;;  %v479_v42 = vrot.slane %v478_v39, 1 }
 0x17f   : > { %v483_v44 = vadd.f32 1e-05, %v481_v41  ;;  %v602_v45 = vmul.f32 0.9, %v481_v41  ;;  %v480_v46 = vadd.f32 %v479_v42, %v478_v39 }
 0x181   : > { %915 = vrsqrt.f32 %v483_v44  ;;  %v604_v47 = vadd.f32 %v602_v45, %v600_v40  ;;  %v482_v52 = vmul.f32 0.001953125, %v480_v46 }
 0x183   : > { %606 = vst.msk [vmem:[%s376_s16] sm:$0x1] %vm595_vm1, %v604_v47  ;;  %v484_v57 = vadd.f32 1e-05, %v482_v52  ;;  %v603_v58 = vmul.f32 0.9, %v482_v52 }
 0x185   : > { %917 = vrsqrt.f32 %v484_v57  ;;  %v605_v60 = vadd.f32 %v603_v58, %v601_v48 }
 0x187   : > { %607 = vst.msk [vmem:[%s376_s16 + $0x1] sm:$0x1] %vm595_vm1, %v605_v60 }
 0x18b   : > { %v916_v61 = vpop.eup %915 }
 0x18c   : > { %v487_v62 = vmul.f32 %v916_v61, %v1169_v55  ;;  %v488_v63 = vmul.f32 %v916_v61, %v1164_v53  ;;  %v491_v0 = vmul.f32 %v916_v61, %v1171_v56  ;;  %v492_v2 = vmul.f32 %v916_v61, %v1166_v54 }
 0x18e   : > { %v825_v1 = vmul.f32 -1.442695, %v487_v62  ;;  %v826_v3 = vmul.f32 -1.442695, %v488_v63  ;;  %v829_v4 = vmul.f32 -1.442695, %v491_v0 }
 0x18f   : > { %v918_v5 = vpop.eup %917  ;;  %v830_v6 = vmul.f32 -1.442695, %v492_v2 }
 0x190   : > { %919 = vpow2.f32 %v825_v1  ;;  %v489_v7 = vmul.f32 %v918_v5, %v1162_v51  ;;  %v490_v8 = vmul.f32 %v918_v5, %v1158_v49  ;;  %v493_v9 = vmul.f32 %v918_v5, %v1178_v59 }
 0x191   : > { %921 = vpow2.f32 %v826_v3  ;;  %v494_v55 = vmul.f32 %v918_v5, %v1160_v50 }
 0x192   : > { %923 = vpow2.f32 %v829_v4  ;;  %v827_v53 = vmul.f32 -1.442695, %v489_v7  ;;  %v828_v56 = vmul.f32 -1.442695, %v490_v8  ;;  %v831_v10 = vmul.f32 -1.442695, %v493_v9 }
 0x193   : > { %925 = vpow2.f32 %v830_v6  ;;  %v832_v54 = vmul.f32 -1.442695, %v494_v55 }
 0x194   : > { %927 = vpow2.f32 %v827_v53 }
 0x195   : > { %929 = vpow2.f32 %v828_v56 }
 0x196   : > { %931 = vpow2.f32 %v831_v10 }
 0x197   : > { %933 = vpow2.f32 %v832_v54 }
 0x19a   : > { %v920_v11 = vpop.eup %919 }
 0x19b   : > { %v922_v12 = vpop.eup %921  ;;  %v519_v51 = vadd.f32 1.0, %v920_v11 }
 0x19c   : > { %v924_v13 = vpop.eup %923  ;;  %v520_v49 = vadd.f32 1.0, %v922_v12 }
 0x19d   : > { %v926_v14 = vpop.eup %925  ;;  %v523_v59 = vadd.f32 1.0, %v924_v13  ;;  %935 = vrcp.f32 %v519_v51 }
 0x19e   : > { %v928_v15 = vpop.eup %927  ;;  %v524_v50 = vadd.f32 1.0, %v926_v14  ;;  %937 = vrcp.f32 %v520_v49 }
 0x19f   : > { %v930_v16 = vpop.eup %929  ;;  %939 = vrcp.f32 %v523_v59  ;;  %v521_v17 = vadd.f32 1.0, %v928_v15 }
 0x1a0   : > { %v932_v18 = vpop.eup %931  ;;  %941 = vrcp.f32 %v524_v50  ;;  %v522_v19 = vadd.f32 1.0, %v930_v16 }
 0x1a1   : > { %v934_v20 = vpop.eup %933  ;;  %v525_v21 = vadd.f32 1.0, %v932_v18  ;;  %943 = vrcp.f32 %v521_v17 }
 0x1a2   : > { %v526_v22 = vadd.f32 1.0, %v934_v20  ;;  %945 = vrcp.f32 %v522_v19 }
 0x1a3   : > { %947 = vrcp.f32 %v525_v21 }
 0x1a4   : > { %949 = vrcp.f32 %v526_v22 }
 0x1a7   : > { %v936_v23 = vpop.eup %935 }
 0x1a8   : > { %v938_v25 = vpop.eup %937  ;;  %v543_v26 = vmul.f32 %v936_v23, %v487_v62 }
 0x1a9   : > { %v940_v27 = vpop.eup %939  ;;  %v544_v28 = vmul.f32 %v938_v25, %v488_v63 }
 0x1aa   : > { %v942_v29 = vpop.eup %941  ;;  %v547_v30 = vmul.f32 %v940_v27, %v491_v0  ;;  %v571_v31 = vadd.f32 %v565_v24, %v543_v26 }
 0x1ab   : > { %v944_v32 = vpop.eup %943  ;;  %v548_v33 = vmul.f32 %v942_v29, %v492_v2  ;;  %v572_v34 = vadd.f32 %v565_v24, %v544_v28 }
 0x1ac   : > { %v946_v36 = vpop.eup %945  ;;  %v575_v37 = vadd.f32 %v565_v24, %v547_v30  ;;  %579 = vst.msk [vmem:[%s338_s7] sm:$0xff] %vm386_vm0, %v571_v31  ;;  %v545_v38 = vmul.f32 %v944_v32, %v489_v7 }
 0x1ad   : > { %v948_v39 = vpop.eup %947  ;;  %v576_v40 = vadd.f32 %v565_v24, %v548_v33  ;;  %580 = vst.msk [vmem:[%s338_s7 + $0x8] sm:$0xff] %vm386_vm0, %v572_v34  ;;  %v546_v41 = vmul.f32 %v946_v36, %v490_v8 }
 0x1ae   : > { %v950_v42 = vpop.eup %949  ;;  %583 = vst.msk [vmem:[%s338_s7 + $0x20] sm:$0xff] %vm386_vm0, %v575_v37  ;;  %v549_v43 = vmul.f32 %v948_v39, %v493_v9  ;;  %v573_v44 = vadd.f32 %v569_v35, %v545_v38 }
 0x1af   : > { %584 = vst.msk [vmem:[%s338_s7 + $0x28] sm:$0xff] %vm386_vm0, %v576_v40  ;;  %v550_v45 = vmul.f32 %v950_v42, %v494_v55  ;;  %v574_v46 = vadd.f32 %v569_v35, %v546_v41 }
 0x1b0   : > { %v577_v47 = vadd.f32 %v569_v35, %v549_v43  ;;  %581 = vst.msk [vmem:[%s338_s7 + $0x10] sm:$0xff] %vm386_vm0, %v573_v44 }
 0x1b1   : > { %v578_v48 = vadd.f32 %v569_v35, %v550_v45  ;;  %582 = vst.msk [vmem:[%s338_s7 + $0x18] sm:$0xff] %vm386_vm0, %v574_v46 }
 0x1b2   : > { %585 = vst.msk [vmem:[%s338_s7 + $0x30] sm:$0xff] %vm386_vm0, %v577_v47 }
 0x1b3   : > { %586 = vst.msk [vmem:[%s338_s7 + $0x38] sm:$0xff] %vm386_vm0, %v578_v48 }
 0x1b4   : > { %s844_s19 = sshll.u32 %s1061_s25, 9  ;;  %s647_s26 = sshll.u32 %s338_s7, 4  ;;  %s648_s26 = int_to_ptr.vmem [resolvable:$true] %s647_s26 }
 0x1b5   : > { %s630_s12 = scalar_lea.hbm %s1283_s4, %s844_s19  ;;  %s998_s13 = smov 512  }
 0x1b6   : > { %854 = sst [smem:[#allocation9]] (%p1088_p9), %s998_s13  ;;  %s999_s14 = smov 1024  }
 0x1b7   : > { %855 = sst [smem:[#allocation9 + $0x1]] (%p1088_p9), %s999_s14  ;;  %s1000_s18 = smov 4  }
 0x1b8   : > { %856 = sst [smem:[#allocation9 + $0x2]] (%p1088_p9), %s1000_s18  ;;  %s1001_s15 = smov 128  }
 0x1b9   : > { %857 = sst [smem:[#allocation9 + $0x3]] (%p1088_p9), %s1001_s15  ;;  %s1002_s25 = smov 8  }
 0x1ba   : > { %858 = sst [smem:[#allocation9 + $0x4]] (%p1088_p9), %s1001_s15  ;;  %s1003_s17 = smov [#allocation8]  }
 0x1bb   : > { %859 = sst [smem:[#allocation9 + $0x5]] (%p1088_p9), %s1002_s25  ;;  %s1004_s20 = smov 0  }
 0x1bc   : > { %860 = dma.general (%p1088_p9), %s648_s26, 1024, %s630_s12, %s609_s30, %s1003_s17, [#allocation9], %s1004_s20, 0  }
 0x1bd PF: > { %s683_s11 = sand.u32 1, %s977_s21   ;;  %p863_p2 = pnand %p810_p11, %p1092_p10 }
 0x1be   : > { %s684_s8 = scalar_lea.sflag [#allocation4], %s683_s11 }
 0x1bf   : > { %972 = dma.done.wait (!%p863_p2), %s684_s8, 1024  }
 0x1c0   : > { %974 = vsyncadd (!%p863_p2), %s684_s8, 4294966272  ;;  %s1291_s16 = sld [smem:[#allocation13_spill]]  ;;  %p20_p3 = scmp.ge.s32.totalorder %s1065_s27, 4  }
 0x1c1   : > { %s1292_s21 = smov %s981_s22  ;;  %s1293_s22 = smov %s985_s23 }
 0x1c2   : > { %s1295_s24 = smov %s1065_s27  ;;  %22 = sbr.rel (!%p20_p3) target bundleno = 5 (0x5), region = 124 }
 0x1c6   : > { %s1294_s23 = smov %s1291_s16 }
 0x1c9   :  { %703 = vsyncpa [#allocation3], 1 }
 0x1ca   :  { %705 = vsyncpa [#allocation3 + $0x1], 1 }
 0x1cb   :  { %706 = vsyncpa [#allocation4], 1 }
 0x1cc   :  { %708 = vsyncpa [#allocation4 + $0x1], 1 }

</bundles_post_ra>
